<compile_context>
chip_gen: v7x
topology: tpu7x:2x2x1
jax: 0.10.0
libtpu: 0.0.40
codegen_flags: <defaults>
</compile_context>

<pallas_src>
import functools

import jax
import jax.numpy as jnp
from jax import lax
from jax.experimental import pallas as pl
from jax.experimental.pallas import tpu as pltpu


def _linear_kernel(x_ref, w_ref, b_ref, o_ref):
    # x_ref: (TB, F) VMEM tile
    # w_ref: (N, F)  VMEM (resident across all grid steps; same block index)
    # b_ref: (1, N)  VMEM
    # o_ref: (TB, N) VMEM tile
    # Contract x's F axis against w's F axis -> (TB, N); f32 accumulation.
    acc = lax.dot_general(
        x_ref[...],
        w_ref[...],
        dimension_numbers=(((1,), (1,)), ((), ())),
        preferred_element_type=jnp.float32,
    )
    o_ref[...] = (acc + b_ref[...]).astype(o_ref.dtype)
    # TODO(synk): for very large F with N=2 the MXU is <2% utilized; a VPU
    # broadcast-multiply + lane-reduce path (or batching many heads to a
    # lane-dense >=128 output) would be faster, but is unnecessary here.


@functools.partial(jax.jit, static_argnames=("block_rows",))
def linear_forward(x, weight, bias, *, block_rows=512):
    """Pallas equivalent of torch.nn.Linear(n_features, 2).

    x:      (B, F) float32
    weight: (2, F) float32  (PyTorch layout, NOT transposed in the wrapper)
    bias:   (2,)   float32
    returns (B, 2) float32
    """
    B, F = x.shape
    N, Fw = weight.shape
    assert Fw == F, (Fw, F)

    b2d = bias.reshape(1, N)  # 2D scalar-row operand for TPU layout

    # Batch tile: as large as practical, multiple of 8 (sublane rule) unless
    # it covers the whole batch.
    tb = min(block_rows, B)
    if tb != B:
        tb = max(8, (tb // 8) * 8)
    grid = (pl.cdiv(B, tb),)

    itemsize = jnp.dtype(x.dtype).itemsize
    # double-buffered x tiles + resident weight + double-buffered out tiles + bias
    need = (2 * tb * F * itemsize
            + F * N * jnp.dtype(weight.dtype).itemsize
            + 2 * tb * N * 4
            + N * 4)
    # Raise above v5e's 16 MiB default when needed, stay far under v7x's 64 MiB.
    vmem_limit = int(min(max(2 * need, 8 << 20), 48 << 20))

    cost = pl.CostEstimate(
        flops=2 * B * F * N,
        transcendentals=0,
        bytes_accessed=B * F * itemsize + F * N * 4 + N * 4 + B * N * 4,
    )

    return pl.pallas_call(
        _linear_kernel,
        out_shape=jax.ShapeDtypeStruct((B, N), x.dtype),
        grid_spec=pl.GridSpec(
            grid=grid,
            in_specs=[
                pl.BlockSpec((tb, F), lambda i: (i, 0)),   # x: tiled over batch
                pl.BlockSpec((N, F), lambda i: (0, 0)),    # weight: resident
                pl.BlockSpec((1, N), lambda i: (0, 0)),    # bias: resident
            ],
            out_specs=pl.BlockSpec((tb, N), lambda i: (i, 0)),
        ),
        compiler_params=pltpu.CompilerParams(
            dimension_semantics=("parallel",),             # megacore on v7x
            vmem_limit_bytes=vmem_limit,
        ),
        cost_estimate=cost,
    )(x, weight, b2d)


if __name__ == "__main__":
    key = jax.random.PRNGKey(0)
    k_x, k_w, k_b, k_x2 = jax.random.split(key, 4)

    batch = 8
    n_features = 32

    # Deterministic parameter init (mimics nn.Linear uniform bound 1/sqrt(F)).
    bound = 1.0 / jnp.sqrt(jnp.float32(n_features))
    weight = jax.random.uniform(k_w, (2, n_features), jnp.float32, -bound, bound)
    bias = jax.random.uniform(k_b, (2,), jnp.float32, -bound, bound)

    x = jax.random.normal(k_x, (batch, n_features), jnp.float32)

    out = linear_forward(x, weight, bias)
    out = jax.block_until_ready(out)

    ref = x @ weight.T + bias
    assert out.shape == (batch, 2)
    assert jnp.allclose(out, ref, atol=1e-5, rtol=1e-5)

    # Exercise the tiled / pipelined path (multiple grid steps, ragged tail).
    big_b, big_f = 1032, 256
    bound2 = 1.0 / jnp.sqrt(jnp.float32(big_f))
    w2 = jax.random.uniform(k_w, (2, big_f), jnp.float32, -bound2, bound2)
    b2 = jax.random.uniform(k_b, (2,), jnp.float32, -bound2, bound2)
    x2 = jax.random.normal(k_x2, (big_b, big_f), jnp.float32)

    out2 = linear_forward(x2, w2, b2, block_rows=512)
    out2 = jax.block_until_ready(out2)
    ref2 = x2 @ w2.T + b2
    assert out2.shape == (big_b, 2)
    assert jnp.allclose(out2, ref2, atol=1e-4, rtol=1e-4)

    print("KERNEL_OK")
</pallas_src>

<mosaic_0001>
module attributes {stable_mosaic.version = 11 : i64} {
  func.func @_linear_kernel(%arg0: i32, %arg1: memref<8x32xf32, #tpu.memory_space<vmem>>, %arg2: memref<2x32xf32, #tpu.memory_space<vmem>>, %arg3: memref<1x2xf32, #tpu.memory_space<vmem>>, %arg4: memref<8x2xf32, #tpu.memory_space<vmem>>) attributes {dimension_semantics = [#tpu.dimension_semantics<parallel>], iteration_bounds = array<i64: 1>, scalar_prefetch = 0 : i64, scratch_operands = 0 : i64, tpu.core_type = #tpu.core_type<tc>, window_params = [{transform_indices = @transform_0, window_bounds = array<i64: 8, 32>}, {pipeline_mode = #tpu.pipeline_mode<synchronous>, transform_indices = @transform_1, window_bounds = array<i64: 2, 32>}, {pipeline_mode = #tpu.pipeline_mode<synchronous>, transform_indices = @transform_2, window_bounds = array<i64: 1, 2>}, {transform_indices = @transform_3, window_bounds = array<i64: 8, 2>}]} {
    %c0 = arith.constant 0 : index
    %c0_0 = arith.constant 0 : index
    %0 = vector.load %arg1[%c0, %c0_0] : memref<8x32xf32, #tpu.memory_space<vmem>>, vector<8x32xf32>
    %c0_1 = arith.constant 0 : index
    %c0_2 = arith.constant 0 : index
    %1 = vector.load %arg2[%c0_1, %c0_2] : memref<2x32xf32, #tpu.memory_space<vmem>>, vector<2x32xf32>
    %cst = arith.constant dense<0.000000e+00> : vector<8x2xf32>
    %2 = tpu.matmul %0, %1, %cst {dimension_numbers = #tpu.dot_dimension_numbers<[1], [1], [0], [0], [0, 0, 1, 0], [], []>} : vector<8x32xf32>, vector<2x32xf32>, vector<8x2xf32> -> vector<8x2xf32>
    %c0_3 = arith.constant 0 : index
    %c0_4 = arith.constant 0 : index
    %3 = vector.load %arg3[%c0_3, %c0_4] : memref<1x2xf32, #tpu.memory_space<vmem>>, vector<1x2xf32>
    %4 = vector.broadcast %3 : vector<1x2xf32> to vector<8x2xf32>
    %5 = arith.addf %2, %4 : vector<8x2xf32>
    %c0_5 = arith.constant 0 : index
    %c0_6 = arith.constant 0 : index
    %6 = vector.load %arg4[%c0_5, %c0_6] : memref<8x2xf32, #tpu.memory_space<vmem>>, vector<8x2xf32>
    tpu.vector_store %arg4[%c0_5, %c0_6], %5 {strides = array<i32>} : memref<8x2xf32, #tpu.memory_space<vmem>>, vector<8x2xf32>,
    return
  }
  func.func @transform_0(%arg0: i32) -> (i32, i32) {
    %c0_i32 = arith.constant 0 : i32
    %c0_i32_0 = arith.constant 0 : i32
    return %arg0, %c0_i32 : i32, i32
  }
  func.func @transform_1(%arg0: i32) -> (i32, i32) {
    %c0_i32 = arith.constant 0 : i32
    %c0_i32_0 = arith.constant 0 : i32
    %c0_i32_1 = arith.constant 0 : i32
    return %c0_i32, %c0_i32_0 : i32, i32
  }
  func.func @transform_2(%arg0: i32) -> (i32, i32) {
    %c0_i32 = arith.constant 0 : i32
    %c0_i32_0 = arith.constant 0 : i32
    %c0_i32_1 = arith.constant 0 : i32
    return %c0_i32, %c0_i32_0 : i32, i32
  }
  func.func @transform_3(%arg0: i32) -> (i32, i32) {
    %c0_i32 = arith.constant 0 : i32
    %c0_i32_0 = arith.constant 0 : i32
    return %arg0, %c0_i32 : i32, i32
  }
}

</mosaic_0001>

<bundles_post_ra>
// kernel: linear_forward.1
= control target key start
LH: loop header
LB: loop body
LE: loop exit
PB: predicated region body
PF: predicated region fallthrough
CT: control target
= control target key end

     0   :  { %8 = vsyncpa [#allocation3], 0  ;;  %s156_s12 = smov [#allocation2]   ;;  %s200_s0 = inlined_call_operand.hbm [shape: f32[8,32], index: 0, kind: input, shape index: {}]   ;;  %s201_s1 = inlined_call_operand.vmem [shape: f32[2,32], index: 1, kind: input, shape index: {}]   ;;  %s202_s2 = inlined_call_operand.vmem [shape: f32[1,2], index: 2, kind: input, shape index: {}]   ;;  %s203_s3 = inlined_call_operand.vmem [shape: f32[8,2], index: 3, kind: output, shape index: {}]  }
   0x1   :  { %s15_s13 = sshll.u32 %s156_s12, 4  ;;  %s132_s16 = scalar_lea.hbm %s200_s0, 128  ;;  %s16_s13 = int_to_ptr.vmem [resolvable:$true] %s15_s13 }
   0x2   :  { %p133_p0 = scmp.ne.s32.totalorder %s200_s0, %s132_s16  ;;  %p136_p1 = scmp.lt.u32.totalorder %s132_s16, %s200_s0 }
   0x4   :  { %p138_p2 = pnand %p136_p1, %p133_p0 }
   0x6   :  { %141 = shalt.err (!%p138_p2)
}
   0x7   :  { %s142_s21 = scalar_lea.vmem %s16_s13, 128  ;;  %p147_p4 = scmp.lt.s32.totalorder %s16_s13, %s16_s13 }
   0x8   :  { %p143_p3 = scmp.ne.s32.totalorder %s16_s13, %s142_s21  ;;  %p148_p5 = scmp.lt.s32.totalorder %s142_s21, %s142_s21 }
   0xa   :  { %p149_p6 = por %p148_p5, %p147_p4 }
   0xc   :  { %p150_p7 = pnand %p149_p6, %p143_p3 }
   0xe   :  { %153 = shalt.err (!%p150_p7)
}
   0xf   :  { %18 = dma.hbm_to_vmem [thread:$0]  %s200_s0, 128, %s16_s13, [#allocation3]  }
  0x10   :  { %154 = dma.done.wait [#allocation3], 128  }
  0x11   :  { %155 = vsyncadd [#allocation3], 4294967168  ;;  %v157_v0 = vmov 0.0   ;;  %vm158_vm0 = vmmov 0   ;;  %vm35_vm1 = vcmask 261120   ;;  %v26_v2 = vld [vmem:[#allocation2] sm:$0xff] }
  0x12   :  { %124 = vmatprep.subr.mxu0 %v157_v0  ;;  %126 = vmatprep.mubr.msk.f32.mxu0 %vm158_vm0, %v157_v0  ;;  %v27_v1 = vld [vmem:[%s201_s1] sm:$0x3]  ;;  %vm112_vm2 = vcmask 15360  }
  0x13   :  { %125 = vmatpush3.xpose.msk.msra.mxu0 %vm35_vm1, %v27_v1  ;;  %v119_v3 = vld [vmem:[%s202_s2] ss:$0 sm:$0xff] }
  0x16   :  { %127 = vmatmul.mubr.msk.f32.vlgmr.msra.gmra.mrb[0].mxu0 %vm35_vm1, %v26_v2 }
  0xe9   :  { %v108_v4 = vpop.f32.mrb[0].mxu0 }
  0xea   :  { %v109_v5 = vadd.f32 %v119_v3, %v108_v4  ;;  %v128_v6 = vpop.f32.mrb[1].mxu0 }
  0xec   :  { %113 = vst.msk [vmem:[%s203_s3] sm:$0xff] %vm112_vm2, %v109_v5 }
  0xed   :  { %118 = vsyncpa [#allocation3], 1 }

</bundles_post_ra>
